<compile_context>
chip_gen: v6e
topology: v6e:2x2x1
jax: 0.10.0
libtpu: 0.0.40
codegen_flags: <defaults>
</compile_context>

<pallas_src>
import functools

import jax
import jax.numpy as jnp
from jax.experimental import pallas as pl
from jax.experimental.pallas import tpu as pltpu


# VMEM sizing: keep the whole double-buffered pipeline under ~24 MiB and the
# scoped limit at 32 MiB -> fits comfortably on v7x (64 MiB physical) and is
# far under v5e/v6e (128 MiB).
_VMEM_LIMIT_BYTES = 32 * 1024 * 1024
_VMEM_PIPELINE_BUDGET = 24 * 1024 * 1024


# ---------------------------------------------------------------------------
# One-time probe (cached, runs once per process at trace time): pin down the
# rotation direction of pltpu.roll so the adjacent-pair swap is correct
# regardless of the Mosaic rotate convention.  Probe and main kernel both run
# on the default (compiled TPU) backend, so the cached convention matches.
# ---------------------------------------------------------------------------
@functools.cache
def _roll_matches_jnp_convention() -> bool:
    """True iff pltpu.roll(x, s, ax)[i] == x[(i - s) % n] (jnp.roll semantics)."""

    def probe(x_ref, o_ref):
        o_ref[...] = pltpu.roll(x_ref[...], 1, 1)

    x = jax.lax.broadcasted_iota(jnp.float32, (8, 128), 1)
    out = pl.pallas_call(
        probe, out_shape=jax.ShapeDtypeStruct((8, 128), jnp.float32)
    )(x)
    return bool(out[0, 0] == 127.0)


# ---------------------------------------------------------------------------
# Kernel: rotate one [tS, H, D] block of q and one of k.
#   cos_ref: [tS, 1, D] f32, cos(theta) repeated for both lanes of each pair
#   sin_ref: [tS, 1, D] f32, sin(theta) with the interleave sign baked in
#            (-sin on even lanes, +sin on odd lanes)
# so that   out = x * cos + pair_partner(x) * sin   is a pure element-wise FMA.
# The sublane (head) broadcast of cos/sin is left implicit in each multiply.
# ---------------------------------------------------------------------------
def _rope_qk_kernel(q_ref, k_ref, cos_ref, sin_ref, qo_ref, ko_ref,
                    *, shift_next, shift_prev):
    blk = q_ref.shape                     # (tS, H, D)
    lane_axis = len(blk) - 1
    D = blk[-1]

    # Tiny (1, 1, D) parity mask, broadcast implicitly inside jnp.where.
    lane = jax.lax.broadcasted_iota(jnp.int32, (1, 1, D), lane_axis)
    is_even = (lane & 1) == 0

    def rotate(x_ref, o_ref):
        x_nat = x_ref[...]                               # native dtype
        # Pair-partner swizzle on the native-dtype tile (cheaper XLU traffic
        # for bf16); cross-pair leakage at roll edges is masked by parity.
        nxt = pltpu.roll(x_nat, shift_next, lane_axis)   # nxt[..., i] = x[..., i + 1]
        prv = pltpu.roll(x_nat, shift_prev, lane_axis)   # prv[..., i] = x[..., i - 1]
        x_pair = jnp.where(is_even, nxt, prv).astype(jnp.float32)
        x = x_nat.astype(jnp.float32)
        # Implicit (1 -> H) sublane broadcast of cos/sin fused into the FMAs.
        o_ref[...] = (x * cos_ref[...] + x_pair * sin_ref[...]).astype(o_ref.dtype)

    rotate(q_ref, qo_ref)
    rotate(k_ref, ko_ref)


def _choose_seq_tile(seq_len, batch, num_heads, head_dim, itemsize,
                     budget_bytes=_VMEM_PIPELINE_BUDGET):
    """Seq-tile size whose double-buffered pipeline fits the VMEM budget."""
    # Per seq-row VMEM bytes (x2 for double buffering):
    #   q/k in + q/k out blocks:          4 * H * D * itemsize
    #   cos/sin blocks ((ts,1,D) tables pad to 8 sublanes of f32): 2 * 8 * D * 4
    per_row = 2 * (4 * num_heads * head_dim * itemsize + 2 * 8 * head_dim * 4)
    rows = max(1, budget_bytes // per_row)
    if rows >= seq_len:
        rows = seq_len
        # Keep >= 2 grid steps on a parallel axis so megacore (v7x: 2 TCs)
        # always has work to split when batch == 1.
        if batch == 1 and seq_len > 1:
            rows = -(-seq_len // 2)
    if rows < seq_len and rows >= 8:
        rows = (rows // 8) * 8            # multiple of 8 sublanes
    return max(1, rows)


def _build_rope_tables(freqs_cis):
    """Compact per-lane tables: cos [S,1,D] and sign-baked sin [S,1,D], f32."""
    S, half, _ = freqs_cis.shape
    D = 2 * half
    fc = freqs_cis.astype(jnp.float32)
    cos = jnp.repeat(fc[:, :, 0], 2, axis=-1).reshape(S, 1, D)
    sin = jnp.repeat(fc[:, :, 1], 2, axis=-1).reshape(S, 1, D)
    sign = jnp.where((jnp.arange(D) % 2) == 0, -1.0, 1.0).astype(jnp.float32)
    return cos, sin * sign                # -sin on even lanes, +sin on odd lanes


# ---------------------------------------------------------------------------
# Wrapper
# ---------------------------------------------------------------------------
def apply_rotary_emb_pallas(q, k, freqs_cis=None, *, cos=None, sin=None,
                            seq_tile=None, donate=False):
    """Interleaved RoPE applied to q and k in one fused Pallas kernel.

    q, k:      [B, S, H, D]
    freqs_cis: [S, D // 2, 2] (cos, sin) pairs, or pass prebuilt cos/sin
               tables of shape [S, 1, D] (f32).
    donate:    alias q/k buffers to the outputs (in-place RoPE).
    """
    B, S, H, D = q.shape
    assert k.shape == q.shape, (q.shape, k.shape)
    assert D % 2 == 0, D

    if cos is None or sin is None:
        assert freqs_cis is not None and freqs_cis.shape == (S, D // 2, 2), (
            None if freqs_cis is None else freqs_cis.shape)
        cos, sin = _build_rope_tables(freqs_cis)
    assert cos.shape == (S, 1, D) and sin.shape == (S, 1, D), (cos.shape, sin.shape)

    if seq_tile is None:
        ts = _choose_seq_tile(S, B, H, D, q.dtype.itemsize)
    else:
        ts = min(int(seq_tile), S)
    grid = (pl.cdiv(S, ts), B)            # seq outer -> cos/sin block reused over batch

    if _roll_matches_jnp_convention():
        shift_next, shift_prev = D - 1, 1
    else:
        shift_next, shift_prev = 1, D - 1

    x_spec = pl.BlockSpec((None, ts, H, D), lambda s, b: (b, s, 0, 0))
    tbl_spec = pl.BlockSpec((ts, 1, D), lambda s, b: (s, 0, 0))

    kernel = functools.partial(
        _rope_qk_kernel, shift_next=shift_next, shift_prev=shift_prev)

    q_out, k_out = pl.pallas_call(
        kernel,
        out_shape=(jax.ShapeDtypeStruct(q.shape, q.dtype),
                   jax.ShapeDtypeStruct(k.shape, k.dtype)),
        grid=grid,
        in_specs=[x_spec, x_spec, tbl_spec, tbl_spec],
        out_specs=(x_spec, x_spec),
        input_output_aliases={0: 0, 1: 1} if donate else {},
        compiler_params=pltpu.CompilerParams(
            dimension_semantics=("parallel", "parallel"),
            vmem_limit_bytes=_VMEM_LIMIT_BYTES,
        ),
    )(q, k, cos, sin)
    return q_out, k_out


def precompute_freqs_cis(seq_len, rotary_dim, theta=10000.0,
                         interpolation_factor=None, dtype=jnp.float32):
    """Real (cos, sin) RoPE cache: [seq_len, rotary_dim // 2, 2]."""
    freqs = 1.0 / theta ** (
        jnp.arange(0, rotary_dim, 2, dtype=jnp.float32) / rotary_dim)
    seq_idx = jnp.arange(seq_len, dtype=jnp.float32)
    if interpolation_factor is not None:
        seq_idx = seq_idx * (1.0 / interpolation_factor)
    freqs = jnp.outer(seq_idx, freqs)                    # [seq_len, dim // 2]
    freqs_cis = jnp.stack([jnp.cos(freqs), jnp.sin(freqs)], axis=-1)
    return freqs_cis.astype(dtype)


class RotaryEmbedding:
    """JAX/Pallas port of the torch RotaryEmbedding module (real freqs path)."""

    def __init__(self, dim, max_len=64, theta=10000, dtype=jnp.float32):
        self.dim = dim
        self.max_len = max_len
        self.theta = theta
        self.freqs_cis = precompute_freqs_cis(max_len, dim, theta=theta, dtype=dtype)
        # Signed lane tables precomputed once, always in f32 so angle precision
        # is preserved even when freqs_cis is stored in a low-precision dtype.
        fc32 = precompute_freqs_cis(max_len, dim, theta=theta, dtype=jnp.float32)
        self._cos, self._sin = _build_rope_tables(fc32)

    def __call__(self, q, k, donate=False):
        # q, k: [B, S, H, D]
        seq_len = q.shape[1]
        if seq_len > self.max_len:
            raise ValueError(
                f"seq_len={seq_len} exceeds the precomputed RoPE cache "
                f"(max_len={self.max_len})")
        return apply_rotary_emb_pallas(
            q, k, cos=self._cos[:seq_len], sin=self._sin[:seq_len], donate=donate)


# ---------------------------------------------------------------------------
# Pure-JAX reference (mirrors the torch real-valued interleaved branch).
# ---------------------------------------------------------------------------
def _apply_rotary_emb_ref(x, freqs_cis):
    B, S, H, D = x.shape
    xc = x.astype(jnp.float32).reshape(B, S, H, D // 2, 2)
    x0, x1 = xc[..., 0], xc[..., 1]
    fc = freqs_cis.astype(jnp.float32).reshape(S, 1, D // 2, 2)
    cos, sin = fc[..., 0], fc[..., 1]
    out = jnp.stack([x0 * cos - x1 * sin, x1 * cos + x0 * sin], axis=-1)
    return out.reshape(B, S, H, D).astype(x.dtype)


if __name__ == "__main__":
    B, S, H, D = 2, 8, 4, 32   # batch, seq_len, num_heads, head_dim
    key = jax.random.PRNGKey(0)
    kq, kk, kq2, kk2 = jax.random.split(key, 4)
    q = jax.random.normal(kq, (B, S, H, D), dtype=jnp.float32)
    k = jax.random.normal(kk, (B, S, H, D), dtype=jnp.float32)

    rope = RotaryEmbedding(dim=D, max_len=64, theta=10000)
    q_out, k_out = rope(q, k)
    q_out = jax.block_until_ready(q_out)
    k_out = jax.block_until_ready(k_out)

    fc = rope.freqs_cis[:S]
    q_ref = _apply_rotary_emb_ref(q, fc)
    k_ref = _apply_rotary_emb_ref(k, fc)

    assert q_out.shape == q.shape and q_out.dtype == q.dtype
    assert k_out.shape == k.shape and k_out.dtype == k.dtype
    assert jnp.allclose(q_out, q_ref, atol=1e-5, rtol=1e-5)
    assert jnp.allclose(k_out, k_ref, atol=1e-5, rtol=1e-5)

    # Second check: multi-tile grid over the sequence dim (forced small tile).
    S2 = 32
    q2 = jax.random.normal(kq2, (B, S2, H, D), dtype=jnp.float32)
    k2 = jax.random.normal(kk2, (B, S2, H, D), dtype=jnp.float32)
    fc2 = rope.freqs_cis[:S2]
    q2_out, k2_out = apply_rotary_emb_pallas(q2, k2, fc2, seq_tile=8)
    q2_out = jax.block_until_ready(q2_out)
    k2_out = jax.block_until_ready(k2_out)
    assert jnp.allclose(q2_out, _apply_rotary_emb_ref(q2, fc2), atol=1e-5, rtol=1e-5)
    assert jnp.allclose(k2_out, _apply_rotary_emb_ref(k2, fc2), atol=1e-5, rtol=1e-5)

    print("KERNEL_OK")
</pallas_src>

<mosaic_0001>
module attributes {stable_mosaic.version = 11 : i64} {
  func.func @probe(%arg0: memref<8x128xf32, #tpu.memory_space<vmem>>, %arg1: memref<8x128xf32, #tpu.memory_space<vmem>>) attributes {dimension_semantics = [], scalar_prefetch = 0 : i64, scratch_operands = 0 : i64, tpu.core_type = #tpu.core_type<tc>} {
    %c0 = arith.constant 0 : index
    %c0_0 = arith.constant 0 : index
    %0 = vector.load %arg0[%c0, %c0_0] : memref<8x128xf32, #tpu.memory_space<vmem>>, vector<8x128xf32>
    %c1_i32 = arith.constant 1 : i32
    %1 = tpu.dynamic_rotate %0 by %c1_i32 dim 1 : vector<8x128xf32>, i32 -> vector<8x128xf32>
    %c0_1 = arith.constant 0 : index
    %c0_2 = arith.constant 0 : index
    %2 = vector.load %arg1[%c0_1, %c0_2] : memref<8x128xf32, #tpu.memory_space<vmem>>, vector<8x128xf32>
    tpu.vector_store %arg1[%c0_1, %c0_2], %1 {strides = array<i32>} : memref<8x128xf32, #tpu.memory_space<vmem>>, vector<8x128xf32>,
    return
  }
}

</mosaic_0001>

<bundles_post_ra>
// kernel: tpu_custom_call.1
= control target key start
LH: loop header
LB: loop body
LE: loop exit
PB: predicated region body
PF: predicated region fallthrough
CT: control target
= control target key end

     0   :  { %6 = vsyncpa [#allocation3], 0  ;;  %s106_s0 = inlined_call_operand.hbm [shape: f32[8,128], index: 0, kind: input, shape index: {}]   ;;  %s107_s1 = inlined_call_operand.hbm [shape: f32[8,128], index: 1, kind: output, shape index: {}]  }
   0x1   :  { %7 = vsyncpa [#allocation4], 0  ;;  %s87_s6 = smov [#allocation2]  }
   0x2   :  { %s14_s7 = sshll.u32 %s87_s6, 4  ;;  %s15_s7 = int_to_ptr.vmem [resolvable:$true] %s14_s7 }
   0x3   :  { %s51_s8 = scalar_lea.vmem %s15_s7, 128  ;;  %p56_p1 = scmp.lt.s32.totalorder %s15_s7, %s15_s7 }
   0x4   :  { %p52_p0 = scmp.ne.s32.totalorder %s15_s7, %s51_s8  ;;  %p57_p2 = scmp.lt.s32.totalorder %s51_s8, %s51_s8 }
   0x6   :  { %p58_p3 = por %p57_p2, %p56_p1 }
   0x8   :  { %p59_p4 = pnand %p58_p3, %p52_p0 }
   0xa   :  { %62 = shalt.err (!%p59_p4)
}
   0xb   :  { %17 = dma.hbm_to_vmem [thread:$0]  %s106_s0, 128, %s15_s7, [#allocation3]  }
   0xc   :  { %83 = dma.done.wait [#allocation3], 128  }
   0xd   :  { %84 = vsyncadd [#allocation3], 4294967168  ;;  %v21_v0 = vld [vmem:[#allocation2] sm:$0xff]  ;;  %s88_s11 = smov 1   ;;  %s89_s12 = smov [#allocation5]  }
   0xe   :  { %22 = vrot.lane.b32.xlu0 %v21_v0, %s88_s11  ;;  %s31_s13 = sshll.u32 %s89_s12, 4  ;;  %s32_s13 = int_to_ptr.vmem [resolvable:$true] %s31_s13 }
   0xf   :  { %s63_s14 = scalar_lea.vmem %s32_s13, 128  ;;  %p68_p6 = scmp.lt.s32.totalorder %s32_s13, %s32_s13 }
  0x10   :  { %p64_p5 = scmp.ne.s32.totalorder %s32_s13, %s63_s14  ;;  %p69_p7 = scmp.lt.s32.totalorder %s63_s14, %s63_s14 }
  0x12   :  { %p70_p8 = por %p69_p7, %p68_p6 }
  0x14   :  { %p71_p9 = pnand %p70_p8, %p64_p5 }
  0x80   :  { %v23_v1 = vpop.permute.xlu0 %22 }
  0x81   :  { %24 = vst [vmem:[#allocation5] sm:$0xff] %v23_v1 }
  0x82   :  { %74 = shalt.err (!%p71_p9)
}
  0x83   :  { %34 = dma.vmem_to_hbm [thread:$0]  %s32_s13, 128, %s107_s1, [#allocation4]  }
  0x84   :  { %85 = dma.done.wait [#allocation4], 128  }
  0x85   :  { %86 = vsyncadd [#allocation4], 4294967168 }
  0x86   :  { %38 = vsyncpa [#allocation3], 1 }
  0x87   :  { %39 = vsyncpa [#allocation4], 1 }

</bundles_post_ra>
